<compile_context>
chip_gen: v7x
topology: tpu7x:2x2x1
jax: 0.10.0
libtpu: 0.0.40
codegen_flags: <defaults>
</compile_context>

<pallas_src>
import functools

import jax
import jax.numpy as jnp
from jax import lax
from jax.experimental import pallas as pl
from jax.experimental.pallas import tpu as pltpu


def _round_up(x, m):
    return (x + m - 1) // m * m


# ----------------------------------------------------------------------------
# Pallas kernel: in-VMEM patch build + fused GEMM + bias + ReLU
# ----------------------------------------------------------------------------
def conv_block_kernel(x_ref, w_ref, b_ref, o_ref, *, shifts, tile, apply_relu):
    # x_ref: (Cin_p, Lin_pad)   bf16 flattened zero-padded image (one batch item)
    # w_ref: (Cout, K)          bf16 reshaped conv weight (resident across grid)
    # b_ref: (Cout, 1)          f32 bias
    # o_ref: (Cout, tile)       f32 lane-dense output block (tile % 128 == 0)
    xv = x_ref[...].astype(jnp.float32)            # f32 => layout-safe slicing/concat
    rows = [xv[:, s:s + tile] for s in shifts]     # static shifted lane slices
    patch = jnp.concatenate(rows, axis=0)          # (K, tile) patch slab in vregs
    acc = jnp.dot(w_ref[...], patch.astype(jnp.bfloat16),
                  preferred_element_type=jnp.float32)   # single MXU push
    acc = acc + b_ref[...]
    if apply_relu:
        acc = jnp.maximum(acc, 0.0)
    o_ref[...] = acc.astype(o_ref.dtype)


# ----------------------------------------------------------------------------
# Wrapper: ConvBlock forward (Conv2d + optional eval-mode BN + activation)
# ----------------------------------------------------------------------------
@functools.partial(jax.jit, static_argnames=("padding", "apply_relu"))
def conv_block(x, w, b, bn_params=None, *, padding=1, apply_relu=True):
    """x: (N, Cin, H, W) NCHW f32; w: (Cout, Cin, KH, KW) OIHW; b: (Cout,)."""
    N, Cin, H, W = x.shape
    Cout, _, KH, KW = w.shape
    # TODO(synk): stride > 1 and training-mode BatchNorm (batch statistics) are
    # not implemented; this fused path covers the module defaults (stride=1).

    # Fold eval-mode BatchNorm into the conv weight/bias (inference semantics).
    if bn_params is not None:
        gamma, beta, mean, var = bn_params
        scale = gamma / jnp.sqrt(var + 1e-5)
        w = w * scale[:, None, None, None]
        b = (b - mean) * scale + beta

    # Pad Cin to a multiple of 8 so the in-kernel sublane concat stays aligned.
    Cin_p = _round_up(Cin, 8)
    if Cin_p != Cin:
        x = jnp.pad(x, ((0, 0), (0, Cin_p - Cin), (0, 0), (0, 0)))
        w = jnp.pad(w, ((0, 0), (0, Cin_p - Cin), (0, 0), (0, 0)))

    Hp, Wp = H + 2 * padding, W + 2 * padding
    Hout, Wout = Hp - KH + 1, Wp - KW + 1
    K = KH * KW * Cin_p

    # Padded-frame layout: output pixel (h, w) lives at frame index q = h*Wp + w,
    # so tap (dy, dx) is a pure lane shift of dy*Wp + dx in the flattened image.
    Lq = Hout * Wp                                  # frame covering all valid pixels
    Lq_pad = _round_up(Lq, 128)                     # lane-dense (unmasked) stores
    max_shift = (KH - 1) * Wp + (KW - 1)
    Lin_pad = _round_up(Lq_pad + max_shift, 128)    # all in-kernel reads in-bounds
    shifts = tuple(dy * Wp + dx for dy in range(KH) for dx in range(KW))

    x_pad = jnp.pad(x, ((0, 0), (0, 0), (padding, padding), (padding, padding)))
    x_flat = x_pad.reshape(N, Cin_p, Hp * Wp)
    x_flat = jnp.pad(x_flat, ((0, 0), (0, 0), (0, Lin_pad - Hp * Wp)))
    x_flat = x_flat.astype(jnp.bfloat16)            # halve HBM/VMEM bytes for x

    # Weight (Cout,Cin,KH,KW) -> (Cout,KH,KW,Cin) -> (Cout,K); K order = (dy,dx,c)
    # matching the in-kernel patch-row ordering.
    w_mat = jnp.transpose(w, (0, 2, 3, 1)).reshape(Cout, K).astype(jnp.bfloat16)
    b_col = b.reshape(Cout, 1).astype(jnp.float32)

    # Generation-aware VMEM sanity check (v7x: 64 MiB physical / 32 MiB scoped).
    try:
        vmem_cap = int(getattr(pltpu.get_tpu_info(), "vmem_capacity_bytes",
                               64 * 1024 * 1024))
    except Exception:
        vmem_cap = 64 * 1024 * 1024
    per_step = (2 * Cin_p * Lin_pad * 2            # x block, bf16, double-buffered
                + 2 * Cout * Lq_pad * 4            # out block, f32, double-buffered
                + Cout * K * 2 + Cout * 4          # resident weight + bias
                + Cin_p * Lin_pad * 4              # xv f32 value
                + K * Lq_pad * 4 + Cout * Lq_pad * 4)   # patch slab + accumulator
    # TODO(synk): row-band tiling (halo rows) for images too large for one block.
    assert per_step <= vmem_cap // 2, (
        f"per-step VMEM estimate {per_step}B exceeds budget {vmem_cap // 2}B")

    kern = functools.partial(conv_block_kernel, shifts=shifts, tile=Lq_pad,
                             apply_relu=apply_relu)
    out_frame = pl.pallas_call(
        kern,
        out_shape=jax.ShapeDtypeStruct((N, Cout, Lq_pad), jnp.float32),
        grid=(N,),
        in_specs=[
            pl.BlockSpec((None, Cin_p, Lin_pad), lambda n: (n, 0, 0)),
            pl.BlockSpec((Cout, K), lambda n: (0, 0)),
            pl.BlockSpec((Cout, 1), lambda n: (0, 0)),
        ],
        out_specs=pl.BlockSpec((None, Cout, Lq_pad), lambda n: (n, 0, 0)),
        compiler_params=pltpu.CompilerParams(
            dimension_semantics=("parallel",)),     # >=2 images -> both v7x TCs
    )(x_flat, w_mat, b_col)

    # (N, Cout, Lq_pad) -> drop lane/frame padding -> NCHW (reshape + slice only).
    out = out_frame[:, :, :Hout * Wp].reshape(N, Cout, Hout, Wp)
    return out[:, :, :, :Wout]


# ----------------------------------------------------------------------------
# Demo / self-check
# ----------------------------------------------------------------------------
if __name__ == "__main__":
    key = jax.random.PRNGKey(0)
    kx, kw, kb = jax.random.split(key, 3)

    # ConvBlock(inc=8, outc=32) with module defaults: kernel_size=3, padding=1,
    # stride=1, bias=True, activation=ReLU, batch_norm=False.
    N, Cin, H, W = 2, 8, 16, 16
    Cout = 32

    x = jax.random.normal(kx, (N, Cin, H, W), jnp.float32)
    w = jax.random.normal(kw, (Cout, Cin, 3, 3), jnp.float32) * 0.1
    b = jax.random.normal(kb, (Cout,), jnp.float32) * 0.1

    out = jax.block_until_ready(conv_block(x, w, b))

    # Reference with identically bf16-rounded operands (kernel uses the bf16 MXU
    # path with f32 accumulation).
    xb = x.astype(jnp.bfloat16).astype(jnp.float32)
    wb = w.astype(jnp.bfloat16).astype(jnp.float32)
    ref = lax.conv_general_dilated(
        xb, wb, (1, 1), [(1, 1), (1, 1)],
        dimension_numbers=("NCHW", "OIHW", "NCHW"))
    ref = jax.nn.relu(ref + b[None, :, None, None])

    assert out.shape == (N, Cout, H, W), out.shape
    assert bool(jnp.all(jnp.isfinite(out)))
    err = float(jnp.max(jnp.abs(out - ref)))
    assert bool(jnp.allclose(out, ref, atol=1e-2, rtol=1e-2)), err
    print("KERNEL_OK")
</pallas_src>

<mosaic_0001>
module attributes {stable_mosaic.version = 11 : i64} {
  func.func @conv_block_kernel(%arg0: i32, %arg1: memref<1x8x512xbf16, #tpu.memory_space<vmem>>, %arg2: memref<32x72xbf16, #tpu.memory_space<vmem>>, %arg3: memref<32x1xf32, #tpu.memory_space<vmem>>, %arg4: memref<1x32x384xf32, #tpu.memory_space<vmem>>) attributes {dimension_semantics = [#tpu.dimension_semantics<parallel>], iteration_bounds = array<i64: 2>, scalar_prefetch = 0 : i64, scratch_operands = 0 : i64, tpu.core_type = #tpu.core_type<tc>, window_params = [{transform_indices = @transform_0, window_bounds = array<i64: 1, 8, 512>}, {pipeline_mode = #tpu.pipeline_mode<synchronous>, transform_indices = @transform_1, window_bounds = array<i64: 32, 72>}, {pipeline_mode = #tpu.pipeline_mode<synchronous>, transform_indices = @transform_2, window_bounds = array<i64: 32, 1>}, {transform_indices = @transform_3, window_bounds = array<i64: 1, 32, 384>}]} {
    %c0 = arith.constant 0 : index
    %c0_0 = arith.constant 0 : index
    %c0_1 = arith.constant 0 : index
    %0 = vector.load %arg1[%c0, %c0_0, %c0_1] : memref<1x8x512xbf16, #tpu.memory_space<vmem>>, vector<1x8x512xbf16>
    %1 = vector.shape_cast %0 : vector<1x8x512xbf16> to vector<8x512xbf16>
    %2 = arith.extf %1 : vector<8x512xbf16> to vector<8x512xf32>
    %3 = vector.extract_strided_slice %2 {offsets = [0, 0], sizes = [8, 384], strides = [1, 1]} : vector<8x512xf32> to vector<8x384xf32>
    %4 = vector.extract_strided_slice %2 {offsets = [0, 1], sizes = [8, 384], strides = [1, 1]} : vector<8x512xf32> to vector<8x384xf32>
    %5 = vector.extract_strided_slice %2 {offsets = [0, 2], sizes = [8, 384], strides = [1, 1]} : vector<8x512xf32> to vector<8x384xf32>
    %6 = vector.extract_strided_slice %2 {offsets = [0, 18], sizes = [8, 384], strides = [1, 1]} : vector<8x512xf32> to vector<8x384xf32>
    %7 = vector.extract_strided_slice %2 {offsets = [0, 19], sizes = [8, 384], strides = [1, 1]} : vector<8x512xf32> to vector<8x384xf32>
    %8 = vector.extract_strided_slice %2 {offsets = [0, 20], sizes = [8, 384], strides = [1, 1]} : vector<8x512xf32> to vector<8x384xf32>
    %9 = vector.extract_strided_slice %2 {offsets = [0, 36], sizes = [8, 384], strides = [1, 1]} : vector<8x512xf32> to vector<8x384xf32>
    %10 = vector.extract_strided_slice %2 {offsets = [0, 37], sizes = [8, 384], strides = [1, 1]} : vector<8x512xf32> to vector<8x384xf32>
    %11 = vector.extract_strided_slice %2 {offsets = [0, 38], sizes = [8, 384], strides = [1, 1]} : vector<8x512xf32> to vector<8x384xf32>
    %12 = tpu.concatenate %3, %4, %5, %6, %7, %8, %9, %10, %11 in 0 : vector<8x384xf32>, vector<8x384xf32>, vector<8x384xf32>, vector<8x384xf32>, vector<8x384xf32>, vector<8x384xf32>, vector<8x384xf32>, vector<8x384xf32>, vector<8x384xf32> -> vector<72x384xf32>
    %c0_2 = arith.constant 0 : index
    %c0_3 = arith.constant 0 : index
    %13 = vector.load %arg2[%c0_2, %c0_3] : memref<32x72xbf16, #tpu.memory_space<vmem>>, vector<32x72xbf16>
    %14 = arith.truncf %12 : vector<72x384xf32> to vector<72x384xbf16>
    %cst = arith.constant dense<0.000000e+00> : vector<32x384xf32>
    %15 = tpu.matmul %13, %14, %cst {dimension_numbers = #tpu.dot_dimension_numbers<[1], [0], [0], [1], [0, 0, 1, 1], [], []>} : vector<32x72xbf16>, vector<72x384xbf16>, vector<32x384xf32> -> vector<32x384xf32>
    %c0_4 = arith.constant 0 : index
    %c0_5 = arith.constant 0 : index
    %16 = vector.load %arg3[%c0_4, %c0_5] : memref<32x1xf32, #tpu.memory_space<vmem>>, vector<32x1xf32>
    %17 = vector.broadcast %16 : vector<32x1xf32> to vector<32x384xf32>
    %18 = arith.addf %15, %17 : vector<32x384xf32>
    %cst_6 = arith.constant 0.000000e+00 : f32
    %19 = vector.broadcast %cst_6 : f32 to vector<32x384xf32>
    %20 = arith.maximumf %18, %19 : vector<32x384xf32>
    %c0_7 = arith.constant 0 : index
    %c0_8 = arith.constant 0 : index
    %c0_9 = arith.constant 0 : index
    %21 = vector.load %arg4[%c0_7, %c0_8, %c0_9] : memref<1x32x384xf32, #tpu.memory_space<vmem>>, vector<1x32x384xf32>
    %22 = vector.shape_cast %21 : vector<1x32x384xf32> to vector<32x384xf32>
    %23 = vector.shape_cast %20 : vector<32x384xf32> to vector<1x32x384xf32>
    tpu.vector_store %arg4[%c0_7, %c0_8, %c0_9], %23 {strides = array<i32>} : memref<1x32x384xf32, #tpu.memory_space<vmem>>, vector<1x32x384xf32>,
    return
  }
  func.func @transform_0(%arg0: i32) -> (i32, i32, i32) {
    %c0_i32 = arith.constant 0 : i32
    %c0_i32_0 = arith.constant 0 : i32
    %c0_i32_1 = arith.constant 0 : i32
    return %arg0, %c0_i32, %c0_i32_0 : i32, i32, i32
  }
  func.func @transform_1(%arg0: i32) -> (i32, i32) {
    %c0_i32 = arith.constant 0 : i32
    %c0_i32_0 = arith.constant 0 : i32
    %c0_i32_1 = arith.constant 0 : i32
    return %c0_i32, %c0_i32_0 : i32, i32
  }
  func.func @transform_2(%arg0: i32) -> (i32, i32) {
    %c0_i32 = arith.constant 0 : i32
    %c0_i32_0 = arith.constant 0 : i32
    %c0_i32_1 = arith.constant 0 : i32
    return %c0_i32, %c0_i32_0 : i32, i32
  }
  func.func @transform_3(%arg0: i32) -> (i32, i32, i32) {
    %c0_i32 = arith.constant 0 : i32
    %c0_i32_0 = arith.constant 0 : i32
    %c0_i32_1 = arith.constant 0 : i32
    return %arg0, %c0_i32, %c0_i32_0 : i32, i32, i32
  }
}

</mosaic_0001>

<bundles_post_ra>
// kernel: conv_block.1
= control target key start
LH: loop header
LB: loop body
LE: loop exit
PB: predicated region body
PF: predicated region fallthrough
CT: control target
= control target key end

     0   :  { %s717_s12 = smov 0   ;;  %s827_s0 = inlined_call_operand.vmem [shape: bf16[2,8,512], index: 0, kind: input, shape index: {}]   ;;  %s828_s1 = inlined_call_operand.vmem [shape: bf16[32,72], index: 1, kind: input, shape index: {}]   ;;  %s829_s2 = inlined_call_operand.vmem [shape: f32[32,1], index: 2, kind: input, shape index: {}]   ;;  %s830_s3 = inlined_call_operand.vmem [shape: f32[2,32,384], index: 3, kind: output, shape index: {}]  }
   0x1 LB: > { %s553_s13 = sadd.s32 4294967295, %s686_s12   ;;  %p557_p0 = scmp.ge.s32.totalorder %s686_s12, 1  ;;  %s686_s12 = sphi %s717_s12, %s13_s12  }
   0x2   : > { %p137_p1 = scmp.lt.s32.totalorder %s686_s12, 3 }
   0x4   : > { %p138_p2 = pnand %p557_p0, %p137_p1 }
   0x5   : > { %p161_p3 = scmp.lt.s32.totalorder (!%p138_p2), %s553_s13, 1  ;;  %s688_s18 = smov (!%p138_p2), 126   ;;  %v747_v9 = vld [vmem:[%s828_s1] sm:$0xff] (!%p138_p2)   ;;  %v695_v10 = vmov (!%p138_p2), 0   ;;  %vm355_vm0 = vcmask (!%p138_p2), 588800   ;;  %v323_v12 = vld [vmem:[%s829_s2 + $0x10] sm:$0xff] (!%p138_p2) }
   0x6   : > { %141 = sbr.rel (%p138_p2) target bundleno = 401 (0x191), region = 32  ;;  %s689_s19 = smov (!%p138_p2), 127   ;;  %404 = vmatprep.mubr.bf16.mxu0 (!%p138_p2), %v695_v10  ;;  %676 = vset.pattern.permute.xlu1 (!%p138_p2), %v695_v10  ;;  %v321_v11 = vld [vmem:[%s829_s2] sm:$0xff] (!%p138_p2)  ;;  %v322_v13 = vld [vmem:[%s829_s2 + $0x8] sm:$0xff] (!%p138_p2)  ;;  %v324_v14 = vld [vmem:[%s829_s2 + $0x18] sm:$0xff] (!%p138_p2)  ;;  %vm190_vm1 = vcmask (!%p138_p2), 1039360  }
   0x7   : > { %s690_s20 = smov (!%p138_p2), 110   ;;  %s691_s21 = smov (!%p138_p2), 108   ;;  %588 = vmatprep.mubr.msk.bf16.mxu1 (!%p138_p2), %vm355_vm0, %v747_v9  ;;  %677 = vset.pattern.permute.xlu0 (!%p138_p2), %v695_v10  ;;  %vm205_vm2 = vcmask (!%p138_p2), 1031168   ;;  %vm220_vm3 = vcmask (!%p138_p2), 900096   ;;  %vm235_vm4 = vcmask (!%p138_p2), 891904   ;;  %vm250_vm5 = vcmask (!%p138_p2), 883712  }
   0x8   : > { %s692_s22 = smov (!%p138_p2), 109   ;;  %s693_s23 = smov (!%p138_p2), 91   ;;  %vm280_vm6 = vcmask (!%p138_p2), 744448   ;;  %vm265_vm7 = vcmask (!%p138_p2), 752640   ;;  %vm295_vm8 = vcmask (!%p138_p2), 736256   ;;  %vm362_vm9 = vcmask (!%p138_p2), 1043456  }
   0x9   : > { %s694_s24 = smov (!%p138_p2), 92   ;;  %s696_s27 = smov (!%p138_p2), 90  }
   0xd   : > { %s832_s13 = smov (!%p161_p3, %s553_s13), 1 }
   0xe   : > { %s570_s14 = sshll.u32 %s832_s13, 4  ;;  %s593_s11 = smul.u32 96, %s832_s13 }
   0xf   : > { %s165_s17 = scalar_lea.vmem %s827_s0, %s570_s14 }
  0x10   : > { %v172_v0 = vld [vmem:[%s165_s17] sm:$0xff]  ;;  %v173_v1 = vld [vmem:[%s165_s17 + $0x8] sm:$0xff]  ;;  %s810_s16 = scalar_lea.vmem %s830_s3, %s593_s11 }
  0x11   : > { %v731_v2 = vunpack.c.h.bf16 %v172_v0  ;;  %v733_v3 = vunpack.c.l.bf16 %v173_v1  ;;  %v735_v4 = vunpack.c.l.bf16 %v172_v0  ;;  %v177_v5 = vunpack.c.h.bf16 %v173_v1 }
  0x13   : > { %v621_v6 = vpack.i.bf16 %v733_v3, %v731_v2  ;;  %v616_v7 = vpack.i.bf16 %v177_v5, %v735_v4  ;;  %v671_v8 = vpack.i.bf16 %v731_v2, %v735_v4 }
  0x15   : > { %622 = vrot.lane.b32.xlu1 %v621_v6, %s688_s18  ;;  %612 = vrot.lane.b32.xlu0 %v621_v6, %s689_s19 }
  0x19   : > { %627 = vrot.lane.b32.xlu1 %v621_v6, %s690_s20  ;;  %617 = vrot.lane.b32.xlu0 %v616_v7, %s689_s19 }
  0x1d   : > { %637 = vrot.lane.b32.xlu1 %v616_v7, %s690_s20  ;;  %632 = vrot.lane.b32.xlu0 %v616_v7, %s688_s18 }
  0x21   : > { %647 = vrot.lane.b32.xlu1 %v621_v6, %s691_s21  ;;  %642 = vrot.lane.b32.xlu0 %v621_v6, %s692_s22 }
  0x25   : > { %657 = vrot.lane.b32.xlu1 %v616_v7, %s691_s21  ;;  %652 = vrot.lane.b32.xlu0 %v616_v7, %s692_s22 }
  0x29   : > { %667 = vrot.lane.b32.xlu1 %v621_v6, %s693_s23  ;;  %662 = vrot.lane.b32.xlu0 %v621_v6, %s694_s24 }
  0x2d   : > { %272 = vrot.lane.b32.xlu1 %v735_v4, %s693_s23  ;;  %257 = vrot.lane.b32.xlu0 %v735_v4, %s694_s24 }
  0x31   : > { %291 = vrot.lane.b32.xlu1 %v733_v3, %s696_s27  ;;  %672 = vrot.lane.b32.xlu0 %v671_v8, %s696_s27 }
  0x35   : > { %278 = vrot.lane.b32.xlu1 %v177_v5, %s693_s23  ;;  %263 = vrot.lane.b32.xlu0 %v177_v5, %s694_s24 }
  0x39   : > { %293 = vrot.lane.b32.xlu0 %v177_v5, %s696_s27  ;;  %327 = vperm.xlu1 %676, %v321_v11  }
  0x3d   : > { %337 = vperm.xlu1 %676, %v323_v12   ;;  %332 = vperm.xlu0 %677, %v322_v13  }
  0x41   : > { %342 = vperm.xlu1 %676, %v324_v14  }
  0x87   : > { %v623_v15 = vpop.permute.xlu1 %622  ;;  %v613_v16 = vpop.permute.xlu0 %612 }
  0x88   : > { %v615_v17 = vunpack.i.h.bf16 %v613_v16  ;;  %v614_v18 = vunpack.i.l.bf16 %v613_v16  ;;  %v625_v19 = vunpack.i.h.bf16 %v623_v15  ;;  %v624_v20 = vunpack.i.l.bf16 %v623_v15 }
  0x8a   : > { %v192_v21 = vsel %vm190_vm1, %v614_v18, %v615_v17  ;;  %v207_v31 = vsel %vm205_vm2, %v624_v20, %v625_v19 }
  0x8b   : > { %v628_v22 = vpop.permute.xlu1 %627  ;;  %v618_v23 = vpop.permute.xlu0 %617  ;;  %v307_v24 = vpack.c.bf16 %v192_v21, %v731_v2 }
  0x8c   : > { %v630_v25 = vunpack.i.h.bf16 %v628_v22  ;;  %v629_v26 = vunpack.i.l.bf16 %v628_v22  ;;  %v620_v27 = vunpack.i.h.bf16 %v618_v23  ;;  %v619_v28 = vunpack.i.l.bf16 %v618_v23 }
  0x8d   : > { %372 = vmatprep.subr.bf16.mxu0 %v307_v24 }
  0x8e   : > { %v191_v29 = vsel %vm190_vm1, %v619_v28, %v614_v18  ;;  %v193_v30 = vsel %vm190_vm1, %v615_v17, %v620_v27  ;;  %v222_v32 = vsel %vm220_vm3, %v629_v26, %v630_v25 }
  0x8f   : > { %v638_v33 = vpop.permute.xlu1 %637  ;;  %v633_v34 = vpop.permute.xlu0 %632  ;;  %v306_v35 = vpack.c.bf16 %v191_v29, %v735_v4  ;;  %v308_v36 = vpack.c.bf16 %v193_v30, %v733_v3  ;;  %v310_v37 = vpack.c.bf16 %v222_v32, %v207_v31 }
  0x90   : > { %v640_v38 = vunpack.i.h.bf16 %v638_v33  ;;  %v639_v39 = vunpack.i.l.bf16 %v638_v33  ;;  %v635_v40 = vunpack.i.h.bf16 %v633_v34  ;;  %v634_v41 = vunpack.i.l.bf16 %v633_v34 }
  0x91   : > { %373 = vmatpush1.bf16.msra.mxu0 %v306_v35  ;;  %578 = vmatprep.subr.bf16.mxu1 %v308_v36 }
  0x92   : > { %374 = vmatprep.subr.bf16.mxu0 %v310_v37  ;;  %579 = vmatpush3.bf16.msra.mxu1 %v308_v36  ;;  %v206_v42 = vsel %vm205_vm2, %v634_v41, %v624_v20  ;;  %v221_v43 = vsel %vm220_vm3, %v639_v39, %v629_v26  ;;  %v208_v44 = vsel %vm205_vm2, %v625_v19, %v635_v40  ;;  %v679_v39 = vld [vmem:[%s828_s1 + $0x8] sm:$0xff]  }
  0x93   : > { %v648_v45 = vpop.permute.xlu1 %647  ;;  %v643_v46 = vpop.permute.xlu0 %642  ;;  %v309_v47 = vpack.c.bf16 %v221_v43, %v206_v42  ;;  %v223_v48 = vsel %vm220_vm3, %v630_v25, %v640_v38 }
  0x94   : > { %v650_v49 = vunpack.i.h.bf16 %v648_v45  ;;  %v649_v50 = vunpack.i.l.bf16 %v648_v45  ;;  %v645_v51 = vunpack.i.h.bf16 %v643_v46  ;;  %v644_v52 = vunpack.i.l.bf16 %v643_v46 }
  0x95   : > { %375 = vmatpush1.bf16.msra.mxu0 %v309_v47  ;;  %v311_v53 = vpack.c.bf16 %v223_v48, %v208_v44 }
  0x96   : > { %v237_v54 = vsel %vm235_vm4, %v644_v52, %v645_v51  ;;  %v252_v55 = vsel %vm250_vm5, %v649_v50, %v650_v49 }
  0x97   : > { %580 = vmatprep.subr.bf16.mxu1 %v311_v53  ;;  %v658_v56 = vpop.permute.xlu1 %657  ;;  %v653_v57 = vpop.permute.xlu0 %652  ;;  %v313_v58 = vpack.c.bf16 %v252_v55, %v237_v54 }
  0x98   : > { %581 = vmatpush3.bf16.msra.mxu1 %v311_v53  ;;  %v660_v59 = vunpack.i.h.bf16 %v658_v56  ;;  %v659_v60 = vunpack.i.l.bf16 %v658_v56  ;;  %v655_v61 = vunpack.i.h.bf16 %v653_v57  ;;  %v654_v62 = vunpack.i.l.bf16 %v653_v57 }
  0x99   : > { %376 = vmatprep.subr.bf16.mxu0 %v313_v58 }
  0x9a   : > { %v236_v63 = vsel %vm235_vm4, %v654_v62, %v644_v52  ;;  %v251_v0 = vsel %vm250_vm5, %v659_v60, %v649_v50  ;;  %v238_v1 = vsel %vm235_vm4, %v645_v51, %v655_v61  ;;  %v253_v2 = vsel %vm250_vm5, %v650_v49, %v660_v59 }
  0x9b   : > { %v668_v3 = vpop.permute.xlu1 %667  ;;  %v663_v4 = vpop.permute.xlu0 %662  ;;  %v312_v5 = vpack.c.bf16 %v251_v0, %v236_v63  ;;  %v314_v6 = vpack.c.bf16 %v253_v2, %v238_v1 }
  0x9c   : > { %v670_v7 = vunpack.i.h.bf16 %v668_v3  ;;  %v669_v8 = vunpack.i.l.bf16 %v668_v3  ;;  %v665_v11 = vunpack.i.h.bf16 %v663_v4  ;;  %v664_v12 = vunpack.i.l.bf16 %v663_v4 }
  0x9d   : > { %377 = vmatpush1.bf16.msra.mxu0 %v312_v5  ;;  %582 = vmatprep.subr.bf16.mxu1 %v314_v6 }
  0x9e   : > { %583 = vmatpush3.bf16.msra.mxu1 %v314_v6  ;;  %v267_v13 = vsel %vm265_vm7, %v664_v12, %v665_v11  ;;  %v282_v14 = vsel %vm280_vm6, %v669_v8, %v670_v7 }
  0x9f   : > { %v273_v15 = vpop.permute.xlu1 %272  ;;  %v258_v16 = vpop.permute.xlu0 %257  ;;  %v316_v17 = vpack.c.bf16 %v282_v14, %v267_v13 }
  0xa0   : > { %v281_v18 = vsel %vm280_vm6, %v273_v15, %v669_v8  ;;  %v266_v19 = vsel %vm265_vm7, %v258_v16, %v664_v12 }
  0xa1   : > { %v315_v20 = vpack.c.bf16 %v281_v18, %v266_v19  ;;  %378 = vmatprep.subr.bf16.mxu0 %v316_v17 }
  0xa3   : > { %v292_v21 = vpop.permute.xlu1 %291  ;;  %v673_v22 = vpop.permute.xlu0 %672  ;;  %379 = vmatpush1.bf16.msra.mxu0 %v315_v20 }
  0xa4   : > { %v675_v23 = vunpack.i.h.bf16 %v673_v22  ;;  %v674_v24 = vunpack.i.l.bf16 %v673_v22 }
  0xa6   : > { %v297_v25 = vsel %vm295_vm8, %v675_v23, %v292_v21  ;;  %v296_v26 = vsel %vm295_vm8, %v674_v24, %v675_v23 }
  0xa7   : > { %v319_v27 = vpack.c.bf16 %v297_v25, %v297_v25  ;;  %v279_v28 = vpop.permute.xlu1 %278  ;;  %v264_v29 = vpop.permute.xlu0 %263  ;;  %v318_v30 = vpack.c.bf16 %v296_v26, %v296_v26 }
  0xa8   : > { %v283_v31 = vsel %vm280_vm6, %v670_v7, %v279_v28  ;;  %v268_v32 = vsel %vm265_vm7, %v665_v11, %v264_v29 }
  0xa9   : > { %v317_v33 = vpack.c.bf16 %v283_v31, %v268_v32  ;;  %563 = vmatprep.subr.msk.bf16.mxu0 %vm362_vm9, %v319_v27  ;;  %v364_v34 = vsel %vm362_vm9, %v318_v30, 0 }
  0xaa   : > { %381 = vmatpush1.bf16.msra.mxu0 %v364_v34 }
  0xab   : > { %v294_v35 = vpop.permute.xlu0 %293  ;;  %584 = vmatprep.subr.bf16.mxu1 %v317_v33 }
  0xac   : > { %v298_v36 = vsel %vm295_vm8, %v292_v21, %v294_v35  ;;  %585 = vmatpush3.bf16.msra.mxu1 %v317_v33 }
  0xad   : > { %v320_v37 = vpack.c.bf16 %v298_v36, %v298_v36  ;;  %564 = vmatmul.mubr.msk.bf16.vlgmr.msra.gmra.mrb[0].mxu0 %vm355_vm0, %v747_v9 }
  0xae   : > { %414 = vmatprep.mubr.bf16.mxu0 %v695_v10 }
  0xaf   : > { %592 = vmatprep.subr.msk.bf16.mxu1 %vm362_vm9, %v320_v37  ;;  %v370_v38 = vsel %vm362_vm9, %v320_v37, 0 }
  0xb0   : > { %587 = vmatpush3.bf16.msra.mxu1 %v370_v38 }
  0xb3   : > { %589 = vmatmul.mubr.msk.bf16.vlgmr.msra.gmra.mrb[0].mxu1 %vm355_vm0, %v679_v39 }
  0xb5   : > { %565 = vmatmul.mubr.msk.bf16.gmra.mrb[4].mxu0 %vm355_vm0, %v679_v39 }
  0xb8   : > { %v328_v40 = vpop.permute.xlu1 %327 }
  0xbc   : > { %v333_v42 = vpop.permute.xlu0 %332  ;;  %v338_v9 = vpop.permute.xlu1 %337 }
  0xc0   : > { %v343_v54 = vpop.permute.xlu1 %342 }
 0x180   : > { %v406_v41 = vpop.f32.mrb[0].mxu0 }
 0x181   : > { %v407_v43 = vadd.f32 %v406_v41, %v328_v40  ;;  %v408_v10 = vpop.f32.mrb[1].mxu0 }
 0x182   : > { %v409_v44 = vadd.f32 %v408_v10, %v328_v40  ;;  %v410_v45 = vpop.f32.mrb[2].mxu0 }
 0x183   : > { %v474_v46 = vmax.f32 %v407_v43, 0.0  ;;  %v411_v47 = vadd.f32 %v410_v45, %v333_v42  ;;  %v412_v48 = vpop.f32.mrb[3].mxu0 }
 0x184   : > { %v475_v49 = vmax.f32 %v409_v44, 0.0  ;;  %v413_v50 = vadd.f32 %v412_v48, %v333_v42 }
 0x185   : > { %486 = vst [vmem:[%s810_s16] sm:$0xff] %v474_v46  ;;  %v477_v51 = vmax.f32 %v411_v47, 0.0 }
 0x186   : > { %487 = vst [vmem:[%s810_s16 + $0x8] sm:$0xff] %v475_v49  ;;  %v478_v52 = vmax.f32 %v413_v50, 0.0  ;;  %v590_v53 = vpop.f32.mrb[0].mxu1 }
 0x187   : > { %489 = vst [vmem:[%s810_s16 + $0x18] sm:$0xff] %v477_v51  ;;  %v468_v55 = vadd.f32 %v590_v53, %v338_v9  ;;  %v459_v56 = vpop.f32.mrb[1].mxu1 }
 0x188   : > { %490 = vst [vmem:[%s810_s16 + $0x20] sm:$0xff] %v478_v52  ;;  %v460_v57 = vadd.f32 %v459_v56, %v328_v40  ;;  %v416_v58 = vpop.f32.mrb[4].mxu0  ;;  %v591_v59 = vpop.f32.mrb[2].mxu1 }
 0x189   : > { %v482_v60 = vmax.f32 %v468_v55, 0.0  ;;  %v417_v61 = vadd.f32 %v416_v58, %v338_v9  ;;  %v471_v62 = vadd.f32 %v591_v59, %v343_v54  ;;  %v418_v63 = vpop.f32.mrb[5].mxu0  ;;  %v462_v0 = vpop.f32.mrb[3].mxu1 }
 0x18a   : > { %v476_v1 = vmax.f32 %v460_v57, 0.0  ;;  %v419_v2 = vadd.f32 %v418_v63, %v338_v9  ;;  %v463_v3 = vadd.f32 %v462_v0, %v333_v42  ;;  %v420_v4 = vpop.f32.mrb[6].mxu0 }
 0x18b   : > { %494 = vst [vmem:[%s810_s16 + $0x40] sm:$0xff] %v482_v60  ;;  %v480_v5 = vmax.f32 %v417_v61, 0.0  ;;  %v485_v6 = vmax.f32 %v471_v62, 0.0  ;;  %v421_v7 = vadd.f32 %v420_v4, %v343_v54  ;;  %v422_v8 = vpop.f32.mrb[7].mxu0 }
 0x18c   : > { %488 = vst [vmem:[%s810_s16 + $0x10] sm:$0xff] %v476_v1  ;;  %v481_v11 = vmax.f32 %v419_v2, 0.0  ;;  %v479_v12 = vmax.f32 %v463_v3, 0.0  ;;  %v423_v13 = vadd.f32 %v422_v8, %v343_v54 }
 0x18d   : > { %492 = vst [vmem:[%s810_s16 + $0x30] sm:$0xff] %v480_v5  ;;  %497 = vst [vmem:[%s810_s16 + $0x58] sm:$0xff] %v485_v6  ;;  %v483_v14 = vmax.f32 %v421_v7, 0.0 }
 0x18e   : > { %493 = vst [vmem:[%s810_s16 + $0x38] sm:$0xff] %v481_v11  ;;  %491 = vst [vmem:[%s810_s16 + $0x28] sm:$0xff] %v479_v12  ;;  %v484_v15 = vmax.f32 %v423_v13, 0.0 }
 0x18f   : > { %495 = vst [vmem:[%s810_s16 + $0x48] sm:$0xff] %v483_v14 }
 0x190   : > { %496 = vst [vmem:[%s810_s16 + $0x50] sm:$0xff] %v484_v15 }
 0x191 PF: > { %s13_s12 = sadd.s32 1, %s686_s12  }
 0x192   : > { %p10_p4 = scmp.ge.s32.totalorder %s13_s12, 4  }
 0x194   :  { %12 = sbr.rel (!%p10_p4) target bundleno = 1 (0x1), region = 62 }

</bundles_post_ra>
